<compile_context>
chip_gen: v7x
topology: tpu7x:2x2x1
jax: 0.10.0
libtpu: 0.0.40
codegen_flags: <defaults>
</compile_context>

<pallas_src>
import jax
import jax.numpy as jnp
from jax import lax
from jax.experimental import pallas as pl
from jax.experimental.pallas import tpu as pltpu

_EPS = 1e-5


def _stats_kernel(x_ref, sum_ref, sqsum_ref):
    """Pass 1: accumulate per-channel sum and sum-of-squares over pixel tiles."""
    first = (pl.program_id(0) == 0) & (pl.program_id(1) == 0)

    @pl.when(first)
    def _():
        sum_ref[...] = jnp.zeros_like(sum_ref)
        sqsum_ref[...] = jnp.zeros_like(sqsum_ref)

    x = x_ref[...].astype(jnp.float32)                        # (C, TILE_P)
    sum_ref[...] += jnp.sum(x, axis=1, keepdims=True)         # lane reduce -> (C, 1)
    sqsum_ref[...] += jnp.sum(x * x, axis=1, keepdims=True)   # (C, 1)


def _apply_kernel(x_ref, scale_ref, bias_ref, alpha_ref, o_ref):
    """Pass 2: normalize + PReLU.  y = x*scale + bias ; out = y*where(y>0,1,alpha)."""
    x = x_ref[...].astype(jnp.float32)            # (C, TILE_P)
    y = x * scale_ref[...] + bias_ref[...]        # (C,1) params broadcast over lanes
    out = y * jnp.where(y > 0, 1.0, alpha_ref[...])
    o_ref[...] = out.astype(o_ref.dtype)


def _pick_tile_p(hw, c):
    """Pick a pixel-tile length: divides hw, multiple of 128 when tiling,
    and keeps a (C, TILE_P) f32 tile around ~2 MiB so double-buffered in/out
    tiles fit v7x's scoped VMEM with headroom."""
    budget_elems = (2 * 1024 * 1024) // 4
    cap = max(128, budget_elems // max(c, 1))
    if hw <= cap:
        return hw                      # full row: (8,128) rule satisfied (full dim)
    if hw % 128 == 0:
        t = (cap // 128) * 128
        while t >= 128:
            if hw % t == 0:
                return t
            t -= 128
    # Fallback: odd spatial size larger than the budget -> take the full row.
    return hw


def br_forward(x_nchw, gamma, beta, alpha):
    """x_nchw: (N, C, H, W); gamma/beta/alpha: (C,). Returns (N, C, H, W)."""
    n, c, h, w = x_nchw.shape
    hw = h * w
    x3d = x_nchw.reshape(n, c, hw)     # contiguous reshape: no data movement

    tile_p = _pick_tile_p(hw, c)
    n_tp = hw // tile_p

    # ---- pass 1: global per-channel sum / sum-of-squares (resident accumulator) ----
    sums, sqsums = pl.pallas_call(
        _stats_kernel,
        out_shape=(jax.ShapeDtypeStruct((c, 1), jnp.float32),
                   jax.ShapeDtypeStruct((c, 1), jnp.float32)),
        grid=(n, n_tp),
        in_specs=[pl.BlockSpec((None, c, tile_p), lambda i, j: (i, 0, j))],
        out_specs=(pl.BlockSpec((c, 1), lambda i, j: (0, 0)),
                   pl.BlockSpec((c, 1), lambda i, j: (0, 0))),
        compiler_params=pltpu.CompilerParams(
            dimension_semantics=("arbitrary", "arbitrary")),
    )(x3d)

    # ---- fold per-channel affine once (tiny C-length vectors, plain JAX) ----
    count = jnp.float32(n * hw)
    mean = sums / count
    var = sqsums / count - mean * mean                 # biased variance (training mode)
    inv_std = lax.rsqrt(var + _EPS)
    scale = inv_std * gamma.reshape(c, 1).astype(jnp.float32)
    bias = beta.reshape(c, 1).astype(jnp.float32) - mean * scale
    alpha2d = alpha.reshape(c, 1).astype(jnp.float32)

    # ---- pass 2: normalize + PReLU, pipelined over pixel tiles ----
    out3d = pl.pallas_call(
        _apply_kernel,
        out_shape=jax.ShapeDtypeStruct((n, c, hw), x_nchw.dtype),
        grid=(n, n_tp),
        in_specs=[
            pl.BlockSpec((None, c, tile_p), lambda i, j: (i, 0, j)),
            pl.BlockSpec((c, 1), lambda i, j: (0, 0)),   # constant block -> DMA'd once
            pl.BlockSpec((c, 1), lambda i, j: (0, 0)),
            pl.BlockSpec((c, 1), lambda i, j: (0, 0)),
        ],
        out_specs=pl.BlockSpec((None, c, tile_p), lambda i, j: (i, 0, j)),
        compiler_params=pltpu.CompilerParams(
            dimension_semantics=("parallel", "parallel")),
    )(x3d, scale, bias, alpha2d)

    return out3d.reshape(n, c, h, w)


if __name__ == "__main__":
    key = jax.random.PRNGKey(0)
    N, C, H, W = 2, 4, 16, 16
    x = jax.random.normal(key, (N, C, H, W), dtype=jnp.float32)

    # Deterministic parameter init matching PyTorch defaults.
    gamma = jnp.ones((C,), jnp.float32)          # BatchNorm2d weight
    beta = jnp.zeros((C,), jnp.float32)          # BatchNorm2d bias
    alpha = jnp.full((C,), 0.25, jnp.float32)    # PReLU per-channel slope

    out = br_forward(x, gamma, beta, alpha)
    out = jax.block_until_ready(out)

    # Pure-JAX reference (training-mode batch norm + PReLU).
    mean = jnp.mean(x, axis=(0, 2, 3), keepdims=True)
    var = jnp.mean((x - mean) ** 2, axis=(0, 2, 3), keepdims=True)
    yhat = (x - mean) / jnp.sqrt(var + _EPS)
    yhat = yhat * gamma.reshape(1, C, 1, 1) + beta.reshape(1, C, 1, 1)
    ref = jnp.where(yhat > 0, yhat, alpha.reshape(1, C, 1, 1) * yhat)
    assert jnp.allclose(out, ref, atol=1e-4, rtol=1e-4), (
        float(jnp.max(jnp.abs(out - ref))))

    print("KERNEL_OK")
</pallas_src>

<mosaic_0001>
module attributes {stable_mosaic.version = 11 : i64} {
  func.func @_stats_kernel(%arg0: i32, %arg1: i32, %arg2: memref<1x4x256xf32, #tpu.memory_space<vmem>>, %arg3: memref<4x1xf32, #tpu.memory_space<vmem>>, %arg4: memref<4x1xf32, #tpu.memory_space<vmem>>) attributes {dimension_semantics = [#tpu.dimension_semantics<arbitrary>, #tpu.dimension_semantics<arbitrary>], iteration_bounds = array<i64: 2, 1>, scalar_prefetch = 0 : i64, scratch_operands = 0 : i64, tpu.core_type = #tpu.core_type<tc>, window_params = [{transform_indices = @transform_0, window_bounds = array<i64: 1, 4, 256>}, {pipeline_mode = #tpu.pipeline_mode<synchronous>, transform_indices = @transform_1, window_bounds = array<i64: 4, 1>}, {pipeline_mode = #tpu.pipeline_mode<synchronous>, transform_indices = @transform_2, window_bounds = array<i64: 4, 1>}]} {
    %c0_i32 = arith.constant 0 : i32
    %0 = arith.cmpi eq, %arg0, %c0_i32 : i32
    %c0_i32_0 = arith.constant 0 : i32
    %1 = arith.cmpi eq, %arg1, %c0_i32_0 : i32
    %2 = arith.andi %0, %1 : i1
    %3 = arith.extui %2 : i1 to i32
    %c0_i32_1 = arith.constant 0 : i32
    %4 = arith.cmpi ne, %3, %c0_i32_1 : i32
    scf.if %4 {
      %cst_13 = arith.constant 0.000000e+00 : f32
      %18 = vector.broadcast %cst_13 : f32 to vector<4x1xf32>
      %c0_14 = arith.constant 0 : index
      %c0_15 = arith.constant 0 : index
      %19 = vector.load %arg3[%c0_14, %c0_15] : memref<4x1xf32, #tpu.memory_space<vmem>>, vector<4x1xf32>
      tpu.vector_store %arg3[%c0_14, %c0_15], %18 {strides = array<i32>} : memref<4x1xf32, #tpu.memory_space<vmem>>, vector<4x1xf32>,
      %cst_16 = arith.constant 0.000000e+00 : f32
      %20 = vector.broadcast %cst_16 : f32 to vector<4x1xf32>
      %c0_17 = arith.constant 0 : index
      %c0_18 = arith.constant 0 : index
      %21 = vector.load %arg4[%c0_17, %c0_18] : memref<4x1xf32, #tpu.memory_space<vmem>>, vector<4x1xf32>
      tpu.vector_store %arg4[%c0_17, %c0_18], %20 {strides = array<i32>} : memref<4x1xf32, #tpu.memory_space<vmem>>, vector<4x1xf32>,
    } else {
    }
    %c0 = arith.constant 0 : index
    %c0_2 = arith.constant 0 : index
    %c0_3 = arith.constant 0 : index
    %5 = vector.load %arg2[%c0, %c0_2, %c0_3] : memref<1x4x256xf32, #tpu.memory_space<vmem>>, vector<1x4x256xf32>
    %6 = vector.shape_cast %5 : vector<1x4x256xf32> to vector<4x256xf32>
    %c0_4 = arith.constant 0 : index
    %c0_5 = arith.constant 0 : index
    %7 = vector.load %arg3[%c0_4, %c0_5] : memref<4x1xf32, #tpu.memory_space<vmem>>, vector<4x1xf32>
    %cst = arith.constant dense<0.000000e+00> : vector<4xf32>
    %8 = vector.multi_reduction <add>, %6, %cst [1] : vector<4x256xf32> to vector<4xf32>
    %9 = vector.shape_cast %8 : vector<4xf32> to vector<4x1xf32>
    %10 = arith.addf %7, %9 : vector<4x1xf32>
    %c0_6 = arith.constant 0 : index
    %c0_7 = arith.constant 0 : index
    %11 = vector.load %arg3[%c0_6, %c0_7] : memref<4x1xf32, #tpu.memory_space<vmem>>, vector<4x1xf32>
    tpu.vector_store %arg3[%c0_6, %c0_7], %10 {strides = array<i32>} : memref<4x1xf32, #tpu.memory_space<vmem>>, vector<4x1xf32>,
    %c0_8 = arith.constant 0 : index
    %c0_9 = arith.constant 0 : index
    %12 = vector.load %arg4[%c0_8, %c0_9] : memref<4x1xf32, #tpu.memory_space<vmem>>, vector<4x1xf32>
    %13 = arith.mulf %6, %6 : vector<4x256xf32>
    %cst_10 = arith.constant dense<0.000000e+00> : vector<4xf32>
    %14 = vector.multi_reduction <add>, %13, %cst_10 [1] : vector<4x256xf32> to vector<4xf32>
    %15 = vector.shape_cast %14 : vector<4xf32> to vector<4x1xf32>
    %16 = arith.addf %12, %15 : vector<4x1xf32>
    %c0_11 = arith.constant 0 : index
    %c0_12 = arith.constant 0 : index
    %17 = vector.load %arg4[%c0_11, %c0_12] : memref<4x1xf32, #tpu.memory_space<vmem>>, vector<4x1xf32>
    tpu.vector_store %arg4[%c0_11, %c0_12], %16 {strides = array<i32>} : memref<4x1xf32, #tpu.memory_space<vmem>>, vector<4x1xf32>,
    return
  }
  func.func @transform_0(%arg0: i32, %arg1: i32) -> (i32, i32, i32) {
    %c0_i32 = arith.constant 0 : i32
    %c0_i32_0 = arith.constant 0 : i32
    return %arg0, %c0_i32, %arg1 : i32, i32, i32
  }
  func.func @transform_1(%arg0: i32, %arg1: i32) -> (i32, i32) {
    %c0_i32 = arith.constant 0 : i32
    %c0_i32_0 = arith.constant 0 : i32
    %c0_i32_1 = arith.constant 0 : i32
    return %c0_i32, %c0_i32_0 : i32, i32
  }
  func.func @transform_2(%arg0: i32, %arg1: i32) -> (i32, i32) {
    %c0_i32 = arith.constant 0 : i32
    %c0_i32_0 = arith.constant 0 : i32
    %c0_i32_1 = arith.constant 0 : i32
    return %c0_i32, %c0_i32_0 : i32, i32
  }
}

</mosaic_0001>

<bundles_post_ra>
// kernel: tpu_custom_call.1
= control target key start
LH: loop header
LB: loop body
LE: loop exit
PB: predicated region body
PF: predicated region fallthrough
CT: control target
= control target key end

     0   :  { %8 = vsyncpa [#allocation3], 0  ;;  %s562_s0 = inlined_call_operand.hbm [shape: f32[2,4,256], index: 0, kind: input, shape index: {}]   ;;  %s563_s1 = inlined_call_operand.vmem [shape: f32[4,1], index: 1, kind: output, shape index: {0}]   ;;  %s564_s2 = inlined_call_operand.vmem [shape: f32[4,1], index: 2, kind: output, shape index: {1}]  }
   0x1   :  { %10 = vsyncpa [#allocation3 + $0x1], 0  ;;  %s423_s9 = smov 0   ;;  %s425_s10 = smov 0  }
   0x2   :  { %s427_s11 = smov 0   ;;  %s429_s12 = smov 0  }
   0x3   :  { %s431_s13 = smov 0   ;;  %s433_s14 = smov 0  }
   0x4 LB: > { %s254_s15 = sadd.s32 4294967295, %s404_s14   ;;  %s28_s16 = sadd.s32 1, %s400_s13  ;;  %s404_s14 = sphi %s433_s14, %s16_s14   ;;  %s400_s13 = sphi %s431_s13, %s574_s13   ;;  %s396_s12 = sphi %s429_s12, %s573_s12   ;;  %s392_s11 = sphi %s427_s11, %s572_s11   ;;  %s388_s10 = sphi %s425_s10, %s571_s10   ;;  %s384_s9 = sphi %s423_s9, %s570_s9  }
   0x5   : > { %p30_p0 = scmp.ge.s32.totalorder %s28_s16, 2  ;;  %s37_s17 = sadd.s32 1, %s392_s11 }
   0x6   : > { %p44_p1 = scmp.ne.s32.totalorder %s392_s11, %s388_s10  ;;  %p45_p2 = scmp.eq.s32.totalorder %s404_s14, 0 }
   0x7   : > { %s576_s16 = smov (%p30_p0, %s28_s16), 0  ;;  %p50_p4 = scmp.ne.s32.totalorder %s388_s10, %s384_s9 }
   0x8   : > { %p459_p3 = por %p45_p2, %p44_p1  ;;  %s32_s19 = ssub.s32 %s400_s13, %s576_s16 }
   0x9   : > { %p51_p5 = scmp.eq.s32.totalorder %s254_s15, 0  ;;  %p35_p6 = scmp.eq.s32.totalorder %s32_s19, 0 }
   0xa   : > { %p273_p8 = scmp.lt.s32.totalorder %s404_s14, 2  ;;  %s116_s22 = sand.u32 1, %s392_s11  }
   0xb   : > { %p466_p7 = por %p51_p5, %p50_p4  ;;  %s265_s23 = sshll.u32 %s400_s13, 7 }
   0xc   : > { %s472_s21 = scalar_select %p35_p6, %s392_s11, %s37_s17  }
   0xd   : > { %s257_s24 = sshll.u32 %s116_s22, 3  ;;  %s479_s27 = scalar_lea.hbm %s562_s0, %s265_s23 }
   0xe   : > { %s120_s28 = scalar_lea.vmem [#allocation2], %s257_s24  ;;  %p483_p9 = pnand %p273_p8, %p459_p3 }
   0xf   : > { %s130_s29 = sshll.u32 %s120_s28, 4  ;;  %s117_s3 = scalar_lea.sflag [#allocation3], %s116_s22  ;;  %s487_s29 = int_to_ptr.vmem [resolvable:$true] %s130_s29 }
  0x10   : > { %s324_s4 = scalar_lea.hbm %s479_s27, 128  ;;  %p326_p13 = pneg %p483_p9 }
  0x11   : > { %p325_p12 = scmp.ne.s32.totalorder %s479_s27, %s324_s4  ;;  %s329_s7 = scalar_lea.hbm %s562_s0, 256 }
  0x12   : > { %p330_p2 = scmp.lt.u32.totalorder %s479_s27, %s562_s0  ;;  %p331_p3 = scmp.lt.u32.totalorder %s329_s7, %s324_s4 }
  0x13   : > { %p327_p0 = pnand %p326_p13, %p325_p12  ;;  %p333_p5 = scmp.lt.u32.totalorder %s324_s4, %s479_s27 }
  0x14   : > { %p332_p4 = por %p331_p3, %p330_p2 }
  0x15   : > { %p328_p1 = pneg %p327_p0 }
  0x16   : > { %p334_p6 = por %p333_p5, %p332_p4 }
  0x18   : > { %p335_p8 = pnand %p334_p6, %p328_p1 }
  0x1a   : > { %338 = shalt.err (!%p335_p8)
}
  0x1b   : > { %s339_s15 = scalar_lea.vmem %s487_s29, 128  ;;  %s406_s17 = smov [#allocation2]  }
  0x1c   : > { %p340_p12 = scmp.ne.s32.totalorder %s487_s29, %s339_s15  ;;  %s344_s18 = sshll.u32 %s406_s17, 4  ;;  %s345_s18 = int_to_ptr.vmem [resolvable:$false] %s344_s18 }
  0x1d   : > { %s346_s19 = scalar_lea.vmem %s345_s18, 256  ;;  %p347_p11 = scmp.lt.s32.totalorder %s487_s29, %s345_s18 }
  0x1e   : > { %p342_p0 = pnand %p340_p12, %p326_p13  ;;  %p348_p2 = scmp.lt.s32.totalorder %s346_s19, %s339_s15 }
  0x20   : > { %p343_p10 = pneg %p342_p0  ;;  %p349_p3 = por %p348_p2, %p347_p11 }
  0x22   : > { %p350_p4 = pnand %p349_p3, %p343_p10 }
  0x24   : > { %353 = shalt.err (!%p350_p4)
}
  0x25   : > { %272 = dma.hbm_to_vmem [thread:$0]  (!%p483_p9), %s479_s27, 128, %s487_s29, %s117_s3  }
  0x26   : > { %p568_p1 = scmp.lt.s32.totalorder %s404_s14, 3  ;;  %p569_p5 = scmp.ge.s32.totalorder %s404_s14, 1 }
  0x28   : > { %p136_p13 = pnand %p569_p5, %p568_p1 }
  0x29   : > { %s141_s22 = sand.u32 (!%p136_p13), 1, %s388_s10  }
  0x2a   : > { %139 = sbr.rel (%p136_p13) target bundleno = 214 (0xd6), region = 24  ;;  %s261_s23 = sshll.u32 (!%p136_p13), %s141_s22, 3 }
  0x2b   : > { %s142_s24 = scalar_lea.sflag (!%p136_p13), [#allocation3], %s141_s22  ;;  %s145_s25 = scalar_lea.vmem (!%p136_p13), [#allocation2], %s261_s23 }
  0x31   : > { %379 = dma.done.wait (%p466_p7), %s142_s24, 128  }
  0x32   : > { %381 = vsyncadd (%p466_p7), %s142_s24, 4294967168  ;;  %p162_p10 = scmp.eq.s32.totalorder %s396_s12, 0 }
  0x33   : > { %vm168_vm0 = vcmask (%p162_p10), 3072   ;;  %v407_v0 = vmov (%p162_p10), 0.0  }
  0x34   : > { %167 = sbr.rel (!%p162_p10) target bundleno = 59 (0x3b), region = 32  ;;  %169 = vst.msk [vmem:[%s563_s1] sm:$0xf] (%p162_p10), %vm168_vm0, %v407_v0  ;;  %170 = vst.msk [vmem:[%s564_s2] sm:$0xf] (%p162_p10), %vm168_vm0, %v407_v0 }
  0x3b PF: > { %v171_v1 = vld [vmem:[%s145_s25] sm:$0xff]  ;;  %vm176_vm1 = vcmask 1043456   ;;  %vm183_vm2 = vcmask 3072  }
  0x3c   : > { %v174_v2 = vcombine.high %v171_v1, %v171_v1  ;;  %v177_v3 = vsel %vm176_vm1, %v171_v1, 0.0  ;;  %v186_v4 = vmul.f32 %v171_v1, %v171_v1  ;;  %v172_v11 = vld [vmem:[%s563_s1] sm:$0xf] }
  0x3d   : > { %v185_v14 = vld [vmem:[%s564_s2] sm:$0xf] }
  0x3e   : > { %v178_v5 = vsel %vm176_vm1, %v174_v2, 0.0  ;;  %v188_v6 = vcombine.high %v186_v4, %v186_v4  ;;  %v190_v7 = vsel %vm176_vm1, %v186_v4, 0.0 }
  0x3f   : > { %v179_v8 = vadd.f32 %v178_v5, %v177_v3 }
  0x40   : > { %v191_v9 = vsel %vm176_vm1, %v188_v6, 0.0 }
  0x41   : > { %180 = vadd.xlane.f32.xlu0 %v179_v8  ;;  %v192_v10 = vadd.f32 %v191_v9, %v190_v7 }
  0x45   : > { %193 = vadd.xlane.f32.xlu0 %v192_v10 }
  0xce   : > { %v181_v12 = vpop.xlane.xlu0 %180 }
  0xcf   : > { %v182_v13 = vadd.f32 %v181_v12, %v172_v11 }
  0xd1   : > { %184 = vst.msk [vmem:[%s563_s1] sm:$0xf] %vm183_vm2, %v182_v13 }
  0xd2   : > { %v194_v15 = vpop.xlane.xlu0 %193 }
  0xd3   : > { %v195_v16 = vadd.f32 %v194_v15, %v185_v14 }
  0xd5   : > { %196 = vst.msk [vmem:[%s564_s2] sm:$0xf] %vm183_vm2, %v195_v16 }
  0xd6 PF: > { %s16_s14 = sadd.s32 1, %s404_s14   ;;  %s570_s9 = smov %s388_s10 }
  0xd7   : > { %p13_p7 = scmp.ge.s32.totalorder %s16_s14, 4   ;;  %s571_s10 = smov %s392_s11 }
  0xd8   : > { %s572_s11 = smov %s472_s21  ;;  %s573_s12 = smov %s400_s13 }
  0xd9   : > { %s574_s13 = smov %s576_s16  ;;  %15 = sbr.rel (!%p13_p7) target bundleno = 4 (0x4), region = 72 }
  0xe0   :  { %214 = vsyncpa [#allocation3], 1 }
  0xe1   :  { %216 = vsyncpa [#allocation3 + $0x1], 1 }

</bundles_post_ra>
